<compile_context>
chip_gen: v5e
topology: v5e:2x2
jax: 0.10.0
libtpu: 0.0.40
codegen_flags: <defaults>
</compile_context>

<pallas_src>
import math
import jax
import jax.numpy as jnp
from jax import lax
from jax.experimental import pallas as pl
from jax.experimental.pallas import tpu as pltpu

# ---------------- small hyper-parameters (consistent with the module) --------
FEATURE_SIZE = 16                     # hp.Sound.Mel_Dim (Feature_Type == 'Mel')
DIFF_SIZE    = 32                     # hp.Diffusion.Size
KERNEL_SIZE  = 3                      # hp.Diffusion.Kernel_Size
STACK        = 2                      # hp.Diffusion.Stack
ENC_SIZE     = 16                     # hp.Encoder.Size
COND_CH      = ENC_SIZE + FEATURE_SIZE   # condition channels of Residual_Block
MAX_STEP     = 8                      # hp.Diffusion.Max_Step
BATCH        = 2
TIME         = 16
PAD          = KERNEL_SIZE // 2

BT      = BATCH * TIME                        # 32 rows, whole batch at once
LANES   = 128                                 # lane-dense packing width
FUSED_K = KERNEL_SIZE * DIFF_SIZE + COND_CH   # 128 (3 conv taps + condition)

# --- packed weight rows (each block starts at a multiple of 8) ---------------
R_PRE   = 0
R_FUSED = R_PRE + FEATURE_SIZE                # 16   (+ i*FUSED_K)
R_RPJ   = R_FUSED + STACK * FUSED_K           # 272  (+ i*DIFF_SIZE)
R_P1    = R_RPJ + STACK * DIFF_SIZE           # 336
R_P2    = R_P1 + DIFF_SIZE                    # 368
W_ROWS  = R_P2 + DIFF_SIZE                    # 400

# --- packed bias rows (one bias vector per row of [8, 128]) ------------------
B_PRE   = 0
B_FUSED = 1                   # + i  (b_conv + b_cond pre-summed in the packer)
B_RPJ   = 1 + STACK           # + i
B_P1    = 1 + 2 * STACK       # 5
B_P2    = B_P1 + 1            # 6
B_ROWS  = 8

# --- packed activation lane offsets (single lane-dense [BT, 128] input) ------
A_NOISED = 0                                  # q-sampled noised features (16)
A_DST    = FEATURE_SIZE                       # 16 (+ i*DIFF_SIZE) precomputed dstep
A_PAD    = A_DST + STACK * DIFF_SIZE          # 80  (16 unused pad lanes)
A_ENC    = LANES - COND_CH                    # 96  enc sits at its xfull position

# --- packed output lane offsets (lanes 48:128 are UNDEFINED) ------------------
O_EPS = 0
O_HID = FEATURE_SIZE                          # hid is a test-only debug output


def _mish(x):
    # x * tanh(softplus(x)), numerically stable softplus
    sp = jnp.maximum(x, 0.0) + jnp.log1p(jnp.exp(-jnp.abs(x)))
    return x * jnp.tanh(sp)


def _sigmoid(x):
    # numerically stable sigmoid via tanh (single EUP op)
    return 0.5 * (jnp.tanh(0.5 * x) + 1.0)


# -----------------------------------------------------------------------------
# Kernel: whole-batch Denoiser forward.  One invocation, no grid.
# -----------------------------------------------------------------------------
def denoiser_kernel(act_ref, w_ref, b_ref, out_ref):
    noised = act_ref[:, A_NOISED:A_NOISED + FEATURE_SIZE]    # [BT, F]
    enc    = act_ref[:, A_ENC:A_ENC + COND_CH]                # [BT, COND]

    # ---- prenet: Conv1d(k=1) + Mish ----
    x = _mish(jnp.dot(noised, w_ref[R_PRE:R_PRE + FEATURE_SIZE, 0:DIFF_SIZE],
                      preferred_element_type=jnp.float32)
              + b_ref[B_PRE:B_PRE + 1, 0:DIFF_SIZE])          # [BT, D]

    # ---- seam masks implementing the K=3 conv's zero padding and keeping the
    #      +/-1 taps from crossing the batch seam (cheap VPU iota/compare) ----
    row_t = lax.broadcasted_iota(jnp.int32, (BT, DIFF_SIZE), 0) % TIME
    mask_prev = (row_t > 0).astype(jnp.float32)               # 0 at t == 0
    mask_next = (row_t < TIME - 1).astype(jnp.float32)        # 0 at t == T-1

    # ---- residual blocks ----
    skip = jnp.zeros((BT, DIFF_SIZE), jnp.float32)
    for i in range(STACK):
        # precomputed diffusion_step 1x1-conv output (step-table gather), per row
        dstep = act_ref[:, A_DST + i * DIFF_SIZE:A_DST + (i + 1) * DIFF_SIZE]
        xin = x + dstep                                        # conv(x + dstep)

        # time shifts via XLU roll (rows are batch-major, t fastest):
        #   x_prev[t] = xin[t-1] (0 at first row of each batch element)
        #   x_next[t] = xin[t+1] (0 at last row)
        x_prev = pltpu.roll(xin, shift=1, axis=0) * mask_prev
        x_next = pltpu.roll(xin, shift=BT - 1, axis=0) * mask_next

        # fused (3-tap conv + condition) as ONE [BT,128] @ [128,2D] matmul;
        # b_conv + b_cond pre-summed into b_ref[B_FUSED + i].
        # TODO(synk): on v7x, decompose into 4 MRB-accumulating dots instead.
        xfull = jnp.concatenate([x_prev, xin, x_next, enc], axis=-1)  # [BT,128]
        y = (jnp.dot(xfull, w_ref[R_FUSED + i * FUSED_K:
                                  R_FUSED + (i + 1) * FUSED_K, 0:2 * DIFF_SIZE],
                     preferred_element_type=jnp.float32)
             + b_ref[B_FUSED + i:B_FUSED + i + 1, 0:2 * DIFF_SIZE])   # [BT,2D]

        g = _sigmoid(y[:, 0:DIFF_SIZE]) * jnp.tanh(y[:, DIFF_SIZE:2 * DIFF_SIZE])
        z = (jnp.dot(g, w_ref[R_RPJ + i * DIFF_SIZE:
                              R_RPJ + (i + 1) * DIFF_SIZE, 0:2 * DIFF_SIZE],
                     preferred_element_type=jnp.float32)
             + b_ref[B_RPJ + i:B_RPJ + i + 1, 0:2 * DIFF_SIZE])       # [BT,2D]
        x = (z[:, 0:DIFF_SIZE] + x) * (1.0 / math.sqrt(2.0))
        skip = skip + z[:, DIFF_SIZE:2 * DIFF_SIZE]

    # ---- skip sum + projection (Conv1d k=1, ReLU, Conv1d k=1) ----
    h = skip * (1.0 / math.sqrt(float(STACK)))
    h = jnp.maximum(jnp.dot(h, w_ref[R_P1:R_P1 + DIFF_SIZE, 0:DIFF_SIZE],
                            preferred_element_type=jnp.float32)
                    + b_ref[B_P1:B_P1 + 1, 0:DIFF_SIZE], 0.0)
    eps = (jnp.dot(h, w_ref[R_P2:R_P2 + DIFF_SIZE, 0:FEATURE_SIZE],
                   preferred_element_type=jnp.float32)
           + b_ref[B_P2:B_P2 + 1, 0:FEATURE_SIZE])                   # [BT, F]

    # lean epilogue: two partial stores; lanes 48:128 of the output are undefined
    out_ref[:, O_EPS:O_EPS + FEATURE_SIZE] = eps
    out_ref[:, O_HID:O_HID + DIFF_SIZE] = h


denoiser_call = pl.pallas_call(
    denoiser_kernel,
    out_shape=jax.ShapeDtypeStruct((BT, LANES), jnp.float32),
    in_specs=[pl.BlockSpec(memory_space=pltpu.MemorySpace.VMEM)] * 3,
    out_specs=pl.BlockSpec(memory_space=pltpu.MemorySpace.VMEM),
)


# ----------------------------- parameters ------------------------------------
def init_params(key):
    keys = jax.random.split(key, 18)

    def w(k, shape, scale=0.1):
        return scale * jax.random.normal(k, shape, jnp.float32)

    p = {}
    p['w_pre'] = w(keys[0], (FEATURE_SIZE, DIFF_SIZE))
    p['b_pre'] = w(keys[1], (1, DIFF_SIZE), 0.02)
    p['w_s1'] = w(keys[2], (DIFF_SIZE, 4 * DIFF_SIZE))
    p['b_s1'] = w(keys[3], (1, 4 * DIFF_SIZE), 0.02)
    p['w_s2'] = w(keys[4], (4 * DIFF_SIZE, DIFF_SIZE))
    p['b_s2'] = w(keys[5], (1, DIFF_SIZE), 0.02)
    p['w_cond'] = w(keys[6], (STACK, COND_CH, 2 * DIFF_SIZE))
    p['b_cond'] = w(keys[7], (STACK, 1, 2 * DIFF_SIZE), 0.02)
    p['w_dst'] = w(keys[8], (STACK, DIFF_SIZE, DIFF_SIZE))
    p['b_dst'] = w(keys[9], (STACK, 1, DIFF_SIZE), 0.02)
    p['w_conv'] = w(keys[10], (STACK * KERNEL_SIZE, DIFF_SIZE, 2 * DIFF_SIZE))
    p['b_conv'] = w(keys[11], (STACK, 1, 2 * DIFF_SIZE), 0.02)
    p['w_rpj'] = w(keys[12], (STACK, DIFF_SIZE, 2 * DIFF_SIZE))
    p['b_rpj'] = w(keys[13], (STACK, 1, 2 * DIFF_SIZE), 0.02)
    p['w_p1'] = w(keys[14], (DIFF_SIZE, DIFF_SIZE))
    p['b_p1'] = w(keys[15], (1, DIFF_SIZE), 0.02)
    # torch.nn.init.zeros_(self.projection[-1].weight) -> final conv weight == 0
    p['w_p2'] = jnp.zeros((DIFF_SIZE, FEATURE_SIZE), jnp.float32)
    p['b_p2'] = w(keys[17], (1, FEATURE_SIZE), 0.02)
    return p


def make_step_tables(p):
    """Precompute the step_ffn output and per-block diffusion_step 1x1-conv
    output for every integer diffusion step (MAX_STEP rows of compute)."""
    steps = jnp.arange(MAX_STEP, dtype=jnp.float32)
    half = DIFF_SIZE // 2
    scl = math.log(10000.0) / (half - 1)
    freq = jnp.exp(jnp.arange(half, dtype=jnp.float32) * -scl)
    ang = steps[:, None] * freq[None, :]
    emb = jnp.concatenate([jnp.sin(ang), jnp.cos(ang)], axis=-1)     # [S, D]

    def mish(x):
        return x * jnp.tanh(jax.nn.softplus(x))

    s = mish(emb @ p['w_s1'] + p['b_s1'])
    s = s @ p['w_s2'] + p['b_s2']                                    # [S, D]
    dstep_table = jnp.stack(
        [s @ p['w_dst'][i] + p['b_dst'][i] for i in range(STACK)])   # [STACK,S,D]
    return dstep_table


def pack_params(p):
    """Pack the remaining weight/bias tensors into two lane-dense arrays and
    precompute the step tables (step_ffn / diffusion_step convs fold away)."""
    w_all = jnp.zeros((W_ROWS, LANES), jnp.float32)

    def put_w(buf, row, mat):
        r, c = mat.shape
        return buf.at[row:row + r, 0:c].set(mat)

    w_all = put_w(w_all, R_PRE, p['w_pre'])
    for i in range(STACK):
        # fused residual-block weight rows: [tap t-1 ; tap t ; tap t+1 ; cond]
        w_fused = jnp.concatenate(
            [p['w_conv'][i * KERNEL_SIZE + k] for k in range(KERNEL_SIZE)]
            + [p['w_cond'][i]], axis=0)                       # [128, 2D]
        w_all = put_w(w_all, R_FUSED + i * FUSED_K, w_fused)
        w_all = put_w(w_all, R_RPJ + i * DIFF_SIZE, p['w_rpj'][i])
    w_all = put_w(w_all, R_P1, p['w_p1'])
    w_all = put_w(w_all, R_P2, p['w_p2'])

    b_all = jnp.zeros((B_ROWS, LANES), jnp.float32)

    def put_b(buf, row, vec):
        vec = vec.reshape(-1)
        return buf.at[row, 0:vec.shape[0]].set(vec)

    b_all = put_b(b_all, B_PRE, p['b_pre'])
    for i in range(STACK):
        b_all = put_b(b_all, B_FUSED + i, p['b_conv'][i] + p['b_cond'][i])
        b_all = put_b(b_all, B_RPJ + i, p['b_rpj'][i])
    b_all = put_b(b_all, B_P1, p['b_p1'])
    b_all = put_b(b_all, B_P2, p['b_p2'])

    dstep_table = make_step_tables(p)
    return w_all, b_all, dstep_table


# ----------------------- diffusion schedule buffers ---------------------------
def make_schedule():
    betas = jnp.linspace(0.0001, 0.06, MAX_STEP)
    alphas = 1.0 - betas
    alphas_cumprod = jnp.cumprod(alphas)
    return jnp.sqrt(alphas_cumprod), jnp.sqrt(1.0 - alphas_cumprod)


# ---------------------------- forward (train path) ----------------------------
def diffusion_forward(w_all, b_all, dstep_table, encodings, features, key):
    """encodings: [B, COND_CH, T], features: [B, F, T] (PyTorch NCL layout)."""
    sqrt_ac, sqrt_om = make_schedule()
    k1, k2 = jax.random.split(key)
    steps = jax.random.randint(k1, (BATCH,), 0, MAX_STEP)
    noises = jax.random.normal(k2, features.shape, jnp.float32)

    # q(x_t | x_0): one fused elementwise op in NCL layout
    noised = (features * sqrt_ac[steps][:, None, None]
              + noises * sqrt_om[steps][:, None, None])              # [B, F, T]

    # per-batch step-table gather (dstep for each residual block)
    dstep_b = jnp.transpose(dstep_table[:, steps, :], (1, 0, 2)).reshape(
        BATCH, STACK * DIFF_SIZE)                                    # [B, 64]

    # single lane-dense packed activation input (one concat, one reshape)
    act = jnp.concatenate(
        [jnp.transpose(noised, (0, 2, 1)),                           # [B,T,F]
         jnp.broadcast_to(dstep_b[:, None, :],
                          (BATCH, TIME, STACK * DIFF_SIZE)),         # [B,T,64]
         jnp.zeros((BATCH, TIME, A_ENC - A_PAD), jnp.float32),       # [B,T,16]
         jnp.transpose(encodings, (0, 2, 1))],                       # [B,T,32]
        axis=-1).reshape(BT, LANES)

    out_packed = denoiser_call(act, w_all, b_all)                    # [BT, 128]
    eps_rows = out_packed[:, O_EPS:O_EPS + FEATURE_SIZE]
    hid_rows = out_packed[:, O_HID:O_HID + DIFF_SIZE]

    epsilons = jnp.transpose(eps_rows.reshape(BATCH, TIME, FEATURE_SIZE),
                             (0, 2, 1))                              # [B, F, T]
    aux = (steps, noised,
           eps_rows.reshape(BATCH, TIME, FEATURE_SIZE),
           hid_rows.reshape(BATCH, TIME, DIFF_SIZE))
    # Module returns (None, noises, epsilons); extras only for verification.
    return (None, noises, epsilons), aux


# TODO(synk): Sampling / P_Sampling / DDIM are host-level python loops over
# timesteps around this same denoiser kernel; only the training forward path
# (features provided) is kernelized here.


# --------------------------- pure-JAX reference -------------------------------
def denoiser_ref(params, noised_btc, enc_btc, t):
    def mish(x):
        return x * jnp.tanh(jax.nn.softplus(x))

    x = mish(noised_btc @ params['w_pre'] + params['b_pre'])
    half = DIFF_SIZE // 2
    scl = math.log(10000.0) / (half - 1)
    freq = jnp.exp(jnp.arange(half, dtype=jnp.float32) * -scl)
    ang = t[:, None].astype(jnp.float32) * freq[None, :]
    s = jnp.concatenate([jnp.sin(ang), jnp.cos(ang)], axis=-1)        # [B, D]
    s = mish(s @ params['w_s1'] + params['b_s1'][0])
    s = s @ params['w_s2'] + params['b_s2'][0]

    skip = jnp.zeros(x.shape, jnp.float32)
    for i in range(STACK):
        cond = enc_btc @ params['w_cond'][i] + params['b_cond'][i]
        dstep = s @ params['w_dst'][i] + params['b_dst'][i][0]
        xin = x + dstep[:, None, :]
        xin_p = jnp.pad(xin, ((0, 0), (PAD, PAD), (0, 0)))
        y = params['b_conv'][i] + cond
        for k in range(KERNEL_SIZE):
            y = y + xin_p[:, k:k + TIME, :] @ params['w_conv'][i * KERNEL_SIZE + k]
        g = jax.nn.sigmoid(y[..., :DIFF_SIZE]) * jnp.tanh(y[..., DIFF_SIZE:])
        z = g @ params['w_rpj'][i] + params['b_rpj'][i]
        x = (z[..., :DIFF_SIZE] + x) / math.sqrt(2.0)
        skip = skip + z[..., DIFF_SIZE:]

    h = skip / math.sqrt(float(STACK))
    h = jnp.maximum(h @ params['w_p1'] + params['b_p1'], 0.0)
    eps = h @ params['w_p2'] + params['b_p2']
    return eps, h


if __name__ == "__main__":
    key = jax.random.PRNGKey(0)
    k_param, k_feat, k_enc, k_fwd = jax.random.split(key, 4)

    params = init_params(k_param)
    w_all, b_all, dstep_table = pack_params(params)

    features = jax.random.normal(k_feat, (BATCH, FEATURE_SIZE, TIME), jnp.float32)
    encodings = jax.random.normal(k_enc, (BATCH, COND_CH, TIME), jnp.float32)

    fwd = jax.jit(diffusion_forward)
    (none_out, noises, epsilons), aux = fwd(w_all, b_all, dstep_table,
                                            encodings, features, k_fwd)
    jax.block_until_ready(epsilons)

    # ---- verification against a pure-JAX mirror of the PyTorch math ----
    steps, noised, eps_btc, hid_btc = aux
    noised_btc = jnp.transpose(noised, (0, 2, 1))
    enc_btc = jnp.transpose(encodings, (0, 2, 1))
    eps_ref, hid_ref = denoiser_ref(params, noised_btc, enc_btc, steps)

    assert none_out is None
    assert epsilons.shape == (BATCH, FEATURE_SIZE, TIME)
    assert noises.shape == (BATCH, FEATURE_SIZE, TIME)
    err_eps = float(jnp.max(jnp.abs(eps_btc - eps_ref)))
    err_hid = float(jnp.max(jnp.abs(hid_btc - hid_ref)))
    # eps ends in the zero-initialized projection weight (exact bias broadcast,
    # tight bound); hid (pre-zero-weight activation) carries the real numerical
    # coverage -- its bound absorbs default-precision MXU f32 matmul
    # differences between the Pallas kernel and the XLA-compiled reference.
    assert err_eps < 1e-5, err_eps
    assert err_hid < 1e-2, err_hid
    print("KERNEL_OK")
</pallas_src>

<mosaic_0001>
module attributes {stable_mosaic.version = 11 : i64} {
  func.func @denoiser_kernel(%arg0: memref<32x128xf32, #tpu.memory_space<vmem>>, %arg1: memref<400x128xf32, #tpu.memory_space<vmem>>, %arg2: memref<8x128xf32, #tpu.memory_space<vmem>>, %arg3: memref<32x128xf32, #tpu.memory_space<vmem>>) attributes {dimension_semantics = [], scalar_prefetch = 0 : i64, scratch_operands = 0 : i64, tpu.core_type = #tpu.core_type<tc>} {
    %c0 = arith.constant 0 : index
    %c0_0 = arith.constant 0 : index
    %0 = vector.load %arg0[%c0, %c0_0] : memref<32x128xf32, #tpu.memory_space<vmem>>, vector<32x16xf32>
    %c0_1 = arith.constant 0 : index
    %c96 = arith.constant 96 : index
    %1 = vector.load %arg0[%c0_1, %c96] : memref<32x128xf32, #tpu.memory_space<vmem>>, vector<32x32xf32>
    %c0_2 = arith.constant 0 : index
    %c0_3 = arith.constant 0 : index
    %2 = vector.load %arg1[%c0_2, %c0_3] : memref<400x128xf32, #tpu.memory_space<vmem>>, vector<16x32xf32>
    %cst = arith.constant dense<0.000000e+00> : vector<32x32xf32>
    %3 = tpu.matmul %0, %2, %cst {dimension_numbers = #tpu.dot_dimension_numbers<[1], [0], [0], [1], [0, 0, 1, 1], [], []>} : vector<32x16xf32>, vector<16x32xf32>, vector<32x32xf32> -> vector<32x32xf32>
    %c0_4 = arith.constant 0 : index
    %c0_5 = arith.constant 0 : index
    %4 = vector.load %arg2[%c0_4, %c0_5] : memref<8x128xf32, #tpu.memory_space<vmem>>, vector<1x32xf32>
    %5 = vector.broadcast %4 : vector<1x32xf32> to vector<32x32xf32>
    %6 = arith.addf %3, %5 : vector<32x32xf32>
    %cst_6 = arith.constant 0.000000e+00 : f32
    %7 = vector.broadcast %cst_6 : f32 to vector<32x32xf32>
    %8 = arith.maximumf %6, %7 : vector<32x32xf32>
    %9 = math.absf %6 : vector<32x32xf32>
    %cst_7 = arith.constant 0.000000e+00 : f32
    %10 = vector.broadcast %cst_7 : f32 to vector<32x32xf32>
    %11 = arith.subf %10, %9 : vector<32x32xf32>
    %12 = math.exp %11 : vector<32x32xf32>
    %13 = math.log1p %12 : vector<32x32xf32>
    %14 = arith.addf %8, %13 : vector<32x32xf32>
    %15 = math.tanh %14 : vector<32x32xf32>
    %16 = arith.mulf %6, %15 : vector<32x32xf32>
    %17 = tpu.iota {dimensions = array<i32: 0>} : vector<32x32xi32>
    %c16_i32 = arith.constant 16 : i32
    %c0_i32 = arith.constant 0 : i32
    %18 = arith.cmpi eq, %c16_i32, %c0_i32 : i32
    %c1_i32 = arith.constant 1 : i32
    %19 = arith.select %18, %c1_i32, %c16_i32 : i32
    %20 = vector.broadcast %19 : i32 to vector<32x32xi32>
    %21 = arith.remsi %17, %20 : vector<32x32xi32>
    %c0_i32_8 = arith.constant 0 : i32
    %22 = vector.broadcast %c0_i32_8 : i32 to vector<32x32xi32>
    %23 = arith.cmpi ne, %21, %22 : vector<32x32xi32>
    %c0_i32_9 = arith.constant 0 : i32
    %24 = vector.broadcast %c0_i32_9 : i32 to vector<32x32xi32>
    %25 = arith.cmpi slt, %21, %24 : vector<32x32xi32>
    %c0_i32_10 = arith.constant 0 : i32
    %26 = arith.cmpi slt, %19, %c0_i32_10 : i32
    %27 = vector.broadcast %26 : i1 to vector<32x32xi1>
    %28 = vector.broadcast %27 : vector<32x32xi1> to vector<32x32xi1>
    %29 = arith.xori %25, %28 : vector<32x32xi1>
    %30 = arith.andi %29, %23 : vector<32x32xi1>
    %31 = vector.broadcast %19 : i32 to vector<32x32xi32>
    %32 = arith.addi %21, %31 : vector<32x32xi32>
    %33 = arith.select %30, %32, %21 : vector<32x32xi1>, vector<32x32xi32>
    %c0_i32_11 = arith.constant 0 : i32
    %34 = vector.broadcast %c0_i32_11 : i32 to vector<32x32xi32>
    %35 = arith.cmpi sgt, %33, %34 : vector<32x32xi32>
    %36 = arith.extui %35 : vector<32x32xi1> to vector<32x32xi32>
    %37 = arith.sitofp %36 : vector<32x32xi32> to vector<32x32xf32>
    %c15_i32 = arith.constant 15 : i32
    %38 = vector.broadcast %c15_i32 : i32 to vector<32x32xi32>
    %39 = arith.cmpi slt, %33, %38 : vector<32x32xi32>
    %40 = arith.extui %39 : vector<32x32xi1> to vector<32x32xi32>
    %41 = arith.sitofp %40 : vector<32x32xi32> to vector<32x32xf32>
    %cst_12 = arith.constant 0.000000e+00 : f32
    %42 = vector.broadcast %cst_12 : f32 to vector<32x32xf32>
    %c0_13 = arith.constant 0 : index
    %c16 = arith.constant 16 : index
    %43 = vector.load %arg0[%c0_13, %c16] : memref<32x128xf32, #tpu.memory_space<vmem>>, vector<32x32xf32>
    %44 = arith.addf %16, %43 : vector<32x32xf32>
    %c1_i32_14 = arith.constant 1 : i32
    %45 = tpu.dynamic_rotate %44 by %c1_i32_14 dim 0 : vector<32x32xf32>, i32 -> vector<32x32xf32>
    %46 = arith.mulf %45, %37 : vector<32x32xf32>
    %c31_i32 = arith.constant 31 : i32
    %47 = tpu.dynamic_rotate %44 by %c31_i32 dim 0 : vector<32x32xf32>, i32 -> vector<32x32xf32>
    %48 = arith.mulf %47, %41 : vector<32x32xf32>
    %49 = tpu.concatenate %46, %44, %48, %1 in 1 : vector<32x32xf32>, vector<32x32xf32>, vector<32x32xf32>, vector<32x32xf32> -> vector<32x128xf32>
    %c16_15 = arith.constant 16 : index
    %c0_16 = arith.constant 0 : index
    %50 = vector.load %arg1[%c16_15, %c0_16] : memref<400x128xf32, #tpu.memory_space<vmem>>, vector<128x64xf32>
    %cst_17 = arith.constant dense<0.000000e+00> : vector<32x64xf32>
    %51 = tpu.matmul %49, %50, %cst_17 {dimension_numbers = #tpu.dot_dimension_numbers<[1], [0], [0], [1], [0, 0, 1, 1], [], []>} : vector<32x128xf32>, vector<128x64xf32>, vector<32x64xf32> -> vector<32x64xf32>
    %c1 = arith.constant 1 : index
    %c0_18 = arith.constant 0 : index
    %52 = vector.load %arg2[%c1, %c0_18] : memref<8x128xf32, #tpu.memory_space<vmem>>, vector<1x64xf32>
    %53 = vector.broadcast %52 : vector<1x64xf32> to vector<32x64xf32>
    %54 = arith.addf %51, %53 : vector<32x64xf32>
    %55 = vector.extract_strided_slice %54 {offsets = [0, 0], sizes = [32, 32], strides = [1, 1]} : vector<32x64xf32> to vector<32x32xf32>
    %cst_19 = arith.constant 5.000000e-01 : f32
    %56 = vector.broadcast %cst_19 : f32 to vector<32x32xf32>
    %57 = arith.mulf %56, %55 : vector<32x32xf32>
    %58 = math.tanh %57 : vector<32x32xf32>
    %cst_20 = arith.constant 1.000000e+00 : f32
    %59 = vector.broadcast %cst_20 : f32 to vector<32x32xf32>
    %60 = arith.addf %58, %59 : vector<32x32xf32>
    %cst_21 = arith.constant 5.000000e-01 : f32
    %61 = vector.broadcast %cst_21 : f32 to vector<32x32xf32>
    %62 = arith.mulf %61, %60 : vector<32x32xf32>
    %63 = vector.extract_strided_slice %54 {offsets = [0, 32], sizes = [32, 32], strides = [1, 1]} : vector<32x64xf32> to vector<32x32xf32>
    %64 = math.tanh %63 : vector<32x32xf32>
    %65 = arith.mulf %62, %64 : vector<32x32xf32>
    %c272 = arith.constant 272 : index
    %c0_22 = arith.constant 0 : index
    %66 = vector.load %arg1[%c272, %c0_22] : memref<400x128xf32, #tpu.memory_space<vmem>>, vector<32x64xf32>
    %cst_23 = arith.constant dense<0.000000e+00> : vector<32x64xf32>
    %67 = tpu.matmul %65, %66, %cst_23 {dimension_numbers = #tpu.dot_dimension_numbers<[1], [0], [0], [1], [0, 0, 1, 1], [], []>} : vector<32x32xf32>, vector<32x64xf32>, vector<32x64xf32> -> vector<32x64xf32>
    %c3 = arith.constant 3 : index
    %c0_24 = arith.constant 0 : index
    %68 = vector.load %arg2[%c3, %c0_24] : memref<8x128xf32, #tpu.memory_space<vmem>>, vector<1x64xf32>
    %69 = vector.broadcast %68 : vector<1x64xf32> to vector<32x64xf32>
    %70 = arith.addf %67, %69 : vector<32x64xf32>
    %71 = vector.extract_strided_slice %70 {offsets = [0, 0], sizes = [32, 32], strides = [1, 1]} : vector<32x64xf32> to vector<32x32xf32>
    %72 = arith.addf %71, %16 : vector<32x32xf32>
    %cst_25 = arith.constant 0.707106769 : f32
    %73 = vector.broadcast %cst_25 : f32 to vector<32x32xf32>
    %74 = arith.mulf %72, %73 : vector<32x32xf32>
    %75 = vector.extract_strided_slice %70 {offsets = [0, 32], sizes = [32, 32], strides = [1, 1]} : vector<32x64xf32> to vector<32x32xf32>
    %76 = arith.addf %42, %75 : vector<32x32xf32>
    %c0_26 = arith.constant 0 : index
    %c48 = arith.constant 48 : index
    %77 = vector.load %arg0[%c0_26, %c48] : memref<32x128xf32, #tpu.memory_space<vmem>>, vector<32x32xf32>
    %78 = arith.addf %74, %77 : vector<32x32xf32>
    %c1_i32_27 = arith.constant 1 : i32
    %79 = tpu.dynamic_rotate %78 by %c1_i32_27 dim 0 : vector<32x32xf32>, i32 -> vector<32x32xf32>
    %80 = arith.mulf %79, %37 : vector<32x32xf32>
    %c31_i32_28 = arith.constant 31 : i32
    %81 = tpu.dynamic_rotate %78 by %c31_i32_28 dim 0 : vector<32x32xf32>, i32 -> vector<32x32xf32>
    %82 = arith.mulf %81, %41 : vector<32x32xf32>
    %83 = tpu.concatenate %80, %78, %82, %1 in 1 : vector<32x32xf32>, vector<32x32xf32>, vector<32x32xf32>, vector<32x32xf32> -> vector<32x128xf32>
    %c144 = arith.constant 144 : index
    %c0_29 = arith.constant 0 : index
    %84 = vector.load %arg1[%c144, %c0_29] : memref<400x128xf32, #tpu.memory_space<vmem>>, vector<128x64xf32>
    %cst_30 = arith.constant dense<0.000000e+00> : vector<32x64xf32>
    %85 = tpu.matmul %83, %84, %cst_30 {dimension_numbers = #tpu.dot_dimension_numbers<[1], [0], [0], [1], [0, 0, 1, 1], [], []>} : vector<32x128xf32>, vector<128x64xf32>, vector<32x64xf32> -> vector<32x64xf32>
    %c2 = arith.constant 2 : index
    %c0_31 = arith.constant 0 : index
    %86 = vector.load %arg2[%c2, %c0_31] : memref<8x128xf32, #tpu.memory_space<vmem>>, vector<1x64xf32>
    %87 = vector.broadcast %86 : vector<1x64xf32> to vector<32x64xf32>
    %88 = arith.addf %85, %87 : vector<32x64xf32>
    %89 = vector.extract_strided_slice %88 {offsets = [0, 0], sizes = [32, 32], strides = [1, 1]} : vector<32x64xf32> to vector<32x32xf32>
    %cst_32 = arith.constant 5.000000e-01 : f32
    %90 = vector.broadcast %cst_32 : f32 to vector<32x32xf32>
    %91 = arith.mulf %90, %89 : vector<32x32xf32>
    %92 = math.tanh %91 : vector<32x32xf32>
    %cst_33 = arith.constant 1.000000e+00 : f32
    %93 = vector.broadcast %cst_33 : f32 to vector<32x32xf32>
    %94 = arith.addf %92, %93 : vector<32x32xf32>
    %cst_34 = arith.constant 5.000000e-01 : f32
    %95 = vector.broadcast %cst_34 : f32 to vector<32x32xf32>
    %96 = arith.mulf %95, %94 : vector<32x32xf32>
    %97 = vector.extract_strided_slice %88 {offsets = [0, 32], sizes = [32, 32], strides = [1, 1]} : vector<32x64xf32> to vector<32x32xf32>
    %98 = math.tanh %97 : vector<32x32xf32>
    %99 = arith.mulf %96, %98 : vector<32x32xf32>
    %c304 = arith.constant 304 : index
    %c0_35 = arith.constant 0 : index
    %100 = vector.load %arg1[%c304, %c0_35] : memref<400x128xf32, #tpu.memory_space<vmem>>, vector<32x64xf32>
    %cst_36 = arith.constant dense<0.000000e+00> : vector<32x64xf32>
    %101 = tpu.matmul %99, %100, %cst_36 {dimension_numbers = #tpu.dot_dimension_numbers<[1], [0], [0], [1], [0, 0, 1, 1], [], []>} : vector<32x32xf32>, vector<32x64xf32>, vector<32x64xf32> -> vector<32x64xf32>
    %c4 = arith.constant 4 : index
    %c0_37 = arith.constant 0 : index
    %102 = vector.load %arg2[%c4, %c0_37] : memref<8x128xf32, #tpu.memory_space<vmem>>, vector<1x64xf32>
    %103 = vector.broadcast %102 : vector<1x64xf32> to vector<32x64xf32>
    %104 = arith.addf %101, %103 : vector<32x64xf32>
    %105 = vector.extract_strided_slice %104 {offsets = [0, 32], sizes = [32, 32], strides = [1, 1]} : vector<32x64xf32> to vector<32x32xf32>
    %106 = arith.addf %76, %105 : vector<32x32xf32>
    %cst_38 = arith.constant 0.707106769 : f32
    %107 = vector.broadcast %cst_38 : f32 to vector<32x32xf32>
    %108 = arith.mulf %106, %107 : vector<32x32xf32>
    %c336 = arith.constant 336 : index
    %c0_39 = arith.constant 0 : index
    %109 = vector.load %arg1[%c336, %c0_39] : memref<400x128xf32, #tpu.memory_space<vmem>>, vector<32x32xf32>
    %cst_40 = arith.constant dense<0.000000e+00> : vector<32x32xf32>
    %110 = tpu.matmul %108, %109, %cst_40 {dimension_numbers = #tpu.dot_dimension_numbers<[1], [0], [0], [1], [0, 0, 1, 1], [], []>} : vector<32x32xf32>, vector<32x32xf32>, vector<32x32xf32> -> vector<32x32xf32>
    %c5 = arith.constant 5 : index
    %c0_41 = arith.constant 0 : index
    %111 = vector.load %arg2[%c5, %c0_41] : memref<8x128xf32, #tpu.memory_space<vmem>>, vector<1x32xf32>
    %112 = vector.broadcast %111 : vector<1x32xf32> to vector<32x32xf32>
    %113 = arith.addf %110, %112 : vector<32x32xf32>
    %cst_42 = arith.constant 0.000000e+00 : f32
    %114 = vector.broadcast %cst_42 : f32 to vector<32x32xf32>
    %115 = arith.maximumf %113, %114 : vector<32x32xf32>
    %c368 = arith.constant 368 : index
    %c0_43 = arith.constant 0 : index
    %116 = vector.load %arg1[%c368, %c0_43] : memref<400x128xf32, #tpu.memory_space<vmem>>, vector<32x16xf32>
    %cst_44 = arith.constant dense<0.000000e+00> : vector<32x16xf32>
    %117 = tpu.matmul %115, %116, %cst_44 {dimension_numbers = #tpu.dot_dimension_numbers<[1], [0], [0], [1], [0, 0, 1, 1], [], []>} : vector<32x32xf32>, vector<32x16xf32>, vector<32x16xf32> -> vector<32x16xf32>
    %c6 = arith.constant 6 : index
    %c0_45 = arith.constant 0 : index
    %118 = vector.load %arg2[%c6, %c0_45] : memref<8x128xf32, #tpu.memory_space<vmem>>, vector<1x16xf32>
    %119 = vector.broadcast %118 : vector<1x16xf32> to vector<32x16xf32>
    %120 = arith.addf %117, %119 : vector<32x16xf32>
    %c0_46 = arith.constant 0 : index
    %c0_47 = arith.constant 0 : index
    %121 = vector.load %arg3[%c0_46, %c0_47] : memref<32x128xf32, #tpu.memory_space<vmem>>, vector<32x16xf32>
    tpu.vector_store %arg3[%c0_46, %c0_47], %120 {strides = array<i32>} : memref<32x128xf32, #tpu.memory_space<vmem>>, vector<32x16xf32>,
    %c0_48 = arith.constant 0 : index
    %c16_49 = arith.constant 16 : index
    %122 = vector.load %arg3[%c0_48, %c16_49] : memref<32x128xf32, #tpu.memory_space<vmem>>, vector<32x32xf32>
    tpu.vector_store %arg3[%c0_48, %c16_49], %115 {strides = array<i32>} : memref<32x128xf32, #tpu.memory_space<vmem>>, vector<32x32xf32>,
    return
  }
}

</mosaic_0001>

<bundles_post_ra>
// kernel: diffusion_forward.17
= control target key start
LH: loop header
LB: loop body
LE: loop exit
PB: predicated region body
PF: predicated region fallthrough
CT: control target
= control target key end

     0   :  { %vm22_vm0 = vcmask 130048   ;;  %s903_s20 = smov 112   ;;  %v132_v21 = vlaneseq  ;;  %v904_v45 = vmov 0.0   ;;  %s905_s5 = smov 32   ;;  %vm283_vm11 = vcmask 261120   ;;  %s1371_s1 = inlined_call_operand.vmem [shape: f32[400,128], index: 1, kind: input, shape index: {}]   ;;  %s1372_s0 = inlined_call_operand.vmem [shape: f32[32,128], index: 0, kind: input, shape index: {}]   ;;  %s1373_s2 = inlined_call_operand.vmem [shape: f32[8,128], index: 2, kind: input, shape index: {}]   ;;  %s1374_s3 = inlined_call_operand.vmem [shape: f32[32,128], index: 3, kind: output, shape index: {}]  }
   0x1   :  { %v19_v0 = vld [vmem:[%s1371_s1 + $0x8] sm:$0xff]  ;;  %v18_v1 = vld [vmem:[%s1371_s1] sm:$0xff]  ;;  %v944_v3 = vld [vmem:[%s1372_s0 + $0x10] sm:$0xff]  ;;  %s906_s16 = smov 64   ;;  %vm288_vm12 = vcmask 523264   ;;  %vm293_vm13 = vcmask 785408  }
   0x2   :  { %v939_v2 = vld [vmem:[%s1372_s0] sm:$0xff]  ;;  %49 = vmatpush.msra.mxu0 %v19_v0  ;;  %213 = vrot.lane.b32.xlu1 %v944_v3, %s903_s20  ;;  %v953_v4 = vld [vmem:[%s1372_s0 + $0x8] sm:$0xff]  ;;  %v958_v5 = vld [vmem:[%s1372_s0 + $0x18] sm:$0xff]  ;;  %v980_v25 = vshrl.u32 %v132_v21, 7  ;;  %s907_s8 = smov 96   ;;  %s908_s15 = smov 80  }
   0x3   :  { %209 = vrot.lane.b32.xlu0 %v939_v2, %s903_s20  ;;  %v840_v6 = vld [vmem:[%s1373_s2] ss:$0 sm:$0xff]  ;;  %s909_s27 = smov 16   ;;  %vm792_vm14 = vcmask 392320  }
   0x4   :  { %50 = vmatpush.msra.mxu0 %v18_v1  ;;  %v135_v28 = vadd.s32 16, %v980_v25  ;;  %v141_v55 = vand.u32 15, %v980_v25  ;;  %v313_v1 = vld [vmem:[%s1371_s1 + $0x88] sm:$0xff]  ;;  %vm242_vm6 = vcmp.lt.s32.totalorder %v980_v25, 7  ;;  %vm229_vm7 = vcmp.lt.s32.totalorder %v980_v25, 1 }
   0x5   :  { %801 = vmatmul.msk.f32.vlgmr.msra.gmra.mxu0 %vm22_vm0, %v939_v2  ;;  %316 = vmatpush.msra.mxu1 %v313_v1 }
   0x6   :  { %v155_v38 = vand.u32 15, %v135_v28  ;;  %vm185_vm4 = vcmp.gt.s32.totalorder %v141_v55, 0  ;;  %v134_v28 = vadd.s32 8, %v980_v25 }
   0x7   :  { %v993_v61 = vsel %vm185_vm4, 1.0, %v904_v45 }
   0x8   :  { %vm187_vm2 = vcmp.gt.s32.totalorder %v155_v38, 0 }
   0x9   :  { %v988_v46 = vsel %vm187_vm2, 1.0, %v904_v45 }
   0xa   :  { %215 = vrot.lane.b32.xlu1 %v958_v5, %s903_s20 }
   0xb   :  { %211 = vrot.lane.b32.xlu0 %v953_v4, %s903_s20 }
   0xd   :  { %802 = vmatmul.msk.f32.gmra.mxu0 %vm22_vm0, %v953_v4 }
  0x15   :  { %803 = vmatmul.msk.f32.gmra.mxu0 %vm22_vm0, %v944_v3 }
  0x1d   :  { %804 = vmatmul.msk.f32.gmra.mxu0 %vm22_vm0, %v958_v5 }
  0x75   :  { %v210_v57 = vpop.permute.xlu0 %209 }
  0x7d   :  { %v212_v21 = vpop.permute.xlu0 %211 }
  0x82   :  { %v52_v7 = vpop.f32.mrf.mxu0 }
  0x83   :  { %v971_v8 = vadd.f32 %v840_v6, %v52_v7 }
  0x85   :  { %v68_v9 = vand.u32 2147483647, %v971_v8  ;;  %v64_v39 = vmax.f32 %v971_v8, 0.0 }
  0x87   :  { %v72_v10 = vsub.f32 0.0, %v68_v9 }
  0x89   :  { %v76_v11 = vmul.f32 1.442695, %v72_v10 }
  0x8a   :  { %v55_v12 = vpop.f32.mrf.mxu0 }
  0x8b   :  { %847 = vpow2.f32 %v76_v11  ;;  %v974_v13 = vadd.f32 %v840_v6, %v55_v12 }
  0x8d   :  { %v69_v14 = vand.u32 2147483647, %v974_v13  ;;  %v65_v56 = vmax.f32 %v974_v13, 0.0 }
  0x8f   :  { %v73_v15 = vsub.f32 0.0, %v69_v14 }
  0x91   :  { %v848_v16 = vpop.eup %847  ;;  %v78_v17 = vmul.f32 1.442695, %v73_v15 }
  0x92   :  { %v84_v18 = vadd.f32 1.0, %v848_v16  ;;  %v87_v19 = vmul.f32 -0.5, %v848_v16  ;;  %v58_v20 = vpop.f32.mrf.mxu0  ;;  %v90_v27 = vand.u32 2147483647, %v848_v16 }
  0x93   :  { %849 = vpow2.f32 %v78_v17  ;;  %v977_v22 = vadd.f32 %v840_v6, %v58_v20  ;;  %v310_v17 = vld [vmem:[%s1371_s1 + $0x70] sm:$0xff] }
  0x94   :  { %851 = vlog2.f32 %v84_v18  ;;  %v88_v24 = vadd.f32 1.0, %v87_v19  ;;  %vm91_vm1 = vcmp.lt.f32.partialorder %v90_v27, 0.0004427343 }
  0x95   :  { %v70_v23 = vand.u32 2147483647, %v977_v22 }
  0x96   :  { %v89_v32 = vmul.f32 %v848_v16, %v88_v24  ;;  %v66_v16 = vmax.f32 %v977_v22, 0.0 }
  0x97   :  { %v74_v26 = vsub.f32 0.0, %v70_v23  ;;  %v309_v23 = vld [vmem:[%s1371_s1 + $0x68] sm:$0xff] }
  0x99   :  { %v850_v29 = vpop.eup %849  ;;  %v80_v30 = vmul.f32 1.442695, %v74_v26 }
  0x9a   :  { %v852_v31 = vpop.eup %851  ;;  %v93_v33 = vadd.f32 1.0, %v850_v29  ;;  %v96_v34 = vmul.f32 -0.5, %v850_v29  ;;  %v61_v35 = vpop.f32.mrf.mxu0  ;;  %v99_v47 = vand.u32 2147483647, %v850_v29 }
  0x9b   :  { %v86_v36 = vmul.f32 0.6931472, %v852_v31  ;;  %853 = vpow2.f32 %v80_v30  ;;  %v983_v37 = vadd.f32 %v840_v6, %v61_v35  ;;  %v312_v6 = vld [vmem:[%s1371_s1 + $0x80] sm:$0xff] }
  0x9c   :  { %855 = vlog2.f32 %v93_v33  ;;  %v97_v43 = vadd.f32 1.0, %v96_v34  ;;  %vm100_vm3 = vcmp.lt.f32.partialorder %v99_v47, 0.0004427343  ;;  %317 = vmatpush.msra.mxu1 %v312_v6 }
  0x9d   :  { %v92_v40 = vsel %vm91_vm1, %v89_v32, %v86_v36  ;;  %v71_v41 = vand.u32 2147483647, %v983_v37 }
  0x9e   :  { %v120_v42 = vadd.f32 %v92_v40, %v64_v39  ;;  %v98_v51 = vmul.f32 %v850_v29, %v97_v43  ;;  %v308_v29 = vld [vmem:[%s1371_s1 + $0x60] sm:$0xff]  ;;  %v67_v39 = vmax.f32 %v983_v37, 0.0  ;;  %v214_v40 = vpop.permute.xlu1 %213 }
  0x9f   :  { %v75_v44 = vsub.f32 0.0, %v71_v41  ;;  %v148_v41 = vand.u32 15, %v134_v28 }
  0xa0   :  { %857 = vtanh.f32 %v120_v42  ;;  %v306_v42 = vld [vmem:[%s1371_s1 + $0x50] sm:$0xff] }
  0xa1   :  { %v854_v48 = vpop.eup %853  ;;  %v82_v49 = vmul.f32 1.442695, %v75_v44  ;;  %vm198_vm9 = vcmp.lt.s32.totalorder %v148_v41, 15 }
  0xa2   :  { %v856_v50 = vpop.eup %855  ;;  %v102_v52 = vadd.f32 1.0, %v854_v48  ;;  %v105_v54 = vmul.f32 -0.5, %v854_v48  ;;  %v108_v0 = vand.u32 2147483647, %v854_v48 }
  0xa3   :  { %v95_v53 = vmul.f32 0.6931472, %v856_v50  ;;  %859 = vpow2.f32 %v82_v49  ;;  %v305_v50 = vld [vmem:[%s1371_s1 + $0x48] sm:$0xff] }
  0xa4   :  { %861 = vlog2.f32 %v102_v52  ;;  %v106_v62 = vadd.f32 1.0, %v105_v54  ;;  %vm109_vm5 = vcmp.lt.f32.partialorder %v108_v0, 0.0004427343  ;;  %v136_v52 = vadd.s32 24, %v980_v25  ;;  %v541_v25 = vld [vmem:[%s1371_s1 + $0xf8] sm:$0xff] }
  0xa5   :  { %v101_v58 = vsel %vm100_vm3, %v98_v51, %v95_v53 }
  0xa6   :  { %v858_v59 = vpop.eup %857  ;;  %v121_v60 = vadd.f32 %v101_v58, %v65_v56  ;;  %v107_v14 = vmul.f32 %v854_v48, %v106_v62  ;;  %v1055_v56 = vsel %vm198_vm9, 1.0, %v904_v45 }
  0xa7   :  { %v996_v63 = vmul.f32 %v858_v59, %v971_v8  ;;  %v311_v8 = vld [vmem:[%s1371_s1 + $0x78] sm:$0xff] }
  0xa8   :  { %863 = vtanh.f32 %v121_v60  ;;  %318 = vmatpush.msra.mxu1 %v311_v8  ;;  %v216_v60 = vpop.permute.xlu1 %215 }
  0xa9   :  { %v860_v7 = vpop.eup %859  ;;  %v1005_v9 = vadd.f32 %v210_v57, %v996_v63  ;;  %v162_v57 = vand.u32 15, %v136_v52  ;;  %v388_v52 = vld [vmem:[%s1371_s1 + $0x128] sm:$0xff] }
  0xaa   :  { %v862_v10 = vpop.eup %861  ;;  %v111_v11 = vadd.f32 1.0, %v860_v7  ;;  %v114_v15 = vmul.f32 -0.5, %v860_v7  ;;  %319 = vmatpush.msra.mxu1 %v310_v17  ;;  %v117_v27 = vand.u32 2147483647, %v860_v7  ;;  %v300_v17 = vld [vmem:[%s1371_s1 + $0x20] sm:$0xff]  ;;  %415 = vmatpush.msra.mxu2 %v388_v52 }
  0xab   :  { %v104_v12 = vmul.f32 0.6931472, %v862_v10  ;;  %255 = vrot.lane.b32.xlu2 %v1005_v9, %s905_s5  ;;  %v225_v32 = vrot.slane %v1005_v9, 7  ;;  %v238_v33 = vrot.slane %v1005_v9, 1  ;;  %vm200_vm10 = vcmp.lt.s32.totalorder %v162_v57, 15 }
  0xac   :  { %865 = vlog2.f32 %v111_v11  ;;  %v115_v24 = vadd.f32 1.0, %v114_v15  ;;  %320 = vmatpush.msra.mxu1 %v309_v23  ;;  %vm118_vm8 = vcmp.lt.f32.partialorder %v117_v27, 0.0004427343  ;;  %v1069_v9 = vsel %vm200_vm10, 1.0, %v904_v45  ;;  %v304_v45 = vld [vmem:[%s1371_s1 + $0x40] sm:$0xff]  ;;  %v302_v15 = vld [vmem:[%s1371_s1 + $0x30] sm:$0xff] }
  0xad   :  { %v110_v18 = vsel %vm109_vm5, %v107_v14, %v104_v12  ;;  %v303_v14 = vld [vmem:[%s1371_s1 + $0x38] sm:$0xff] }
  0xae   :  { %v864_v19 = vpop.eup %863  ;;  %v122_v20 = vadd.f32 %v110_v18, %v66_v16  ;;  %v116_v35 = vmul.f32 %v860_v7, %v115_v24  ;;  %321 = vmatpush.msra.mxu1 %v308_v29  ;;  %v301_v16 = vld [vmem:[%s1371_s1 + $0x28] sm:$0xff]  ;;  %v299_v18 = vld [vmem:[%s1371_s1 + $0x18] sm:$0xff] }
  0xaf   :  { %v1020_v26 = vmul.f32 %v864_v19, %v974_v13  ;;  %v307_v13 = vld [vmem:[%s1371_s1 + $0x58] sm:$0xff]  ;;  %v298_v19 = vld [vmem:[%s1371_s1 + $0x10] sm:$0xff] }
  0xb0   :  { %867 = vtanh.f32 %v122_v20  ;;  %322 = vmatpush.msra.mxu1 %v307_v13 }
  0xb1   :  { %v222_v30 = vadd.f32 %v212_v21, %v1020_v26 }
  0xb2   :  { %v866_v31 = vpop.eup %865  ;;  %323 = vmatpush.msra.mxu1 %v306_v42 }
  0xb3   :  { %v113_v34 = vmul.f32 0.6931472, %v866_v31  ;;  %v226_v36 = vrot.slane %v222_v30, 7  ;;  %v239_v38 = vrot.slane %v222_v30, 1  ;;  %257 = vrot.lane.b32.xlu0 %v222_v30, %s905_s5 }
  0xb4   :  { %324 = vmatpush.msra.mxu1 %v305_v50 }
  0xb5   :  { %v119_v43 = vsel %vm118_vm8, %v116_v35, %v113_v34  ;;  %v245_v44 = vsel %vm242_vm6, %v238_v33, %v239_v38  ;;  %v1043_v47 = vsel %vm229_vm7, %v225_v32, %v226_v36 }
  0xb6   :  { %v868_v48 = vpop.eup %867  ;;  %v123_v49 = vadd.f32 %v119_v43, %v67_v39  ;;  %271 = vrot.lane.b32.xlu2 %v245_v44, %s906_s16  ;;  %325 = vmatpush.msra.mxu1 %v304_v45 }
  0xb7   :  { %v1050_v51 = vmul.f32 %v868_v48, %v977_v22 }
  0xb8   :  { %869 = vtanh.f32 %v123_v49  ;;  %326 = vmatpush.msra.mxu1 %v303_v14 }
  0xb9   :  { %v223_v53 = vadd.f32 %v214_v40, %v1050_v51 }
  0xba   :  { %327 = vmatpush.msra.mxu1 %v302_v15 }
  0xbb   :  { %v227_v54 = vrot.slane %v223_v53, 7  ;;  %v240_v55 = vrot.slane %v223_v53, 1 }
  0xbc   :  { %328 = vmatpush.msra.mxu1 %v301_v16 }
  0xbd   :  { %v244_v58 = vsel %vm242_vm6, %v239_v38, %v240_v55  ;;  %v231_v22 = vsel %vm229_vm7, %v226_v36, %v227_v54 }
  0xbe   :  { %v870_v59 = vpop.eup %869  ;;  %259 = vrot.lane.b32.xlu2 %v223_v53, %s905_s5  ;;  %v248_v62 = vmul.f32 %v1055_v56, %v244_v58  ;;  %329 = vmatpush.msra.mxu1 %v300_v17  ;;  %v236_v34 = vmul.f32 %v988_v46, %v231_v22  ;;  %v387_v53 = vld [vmem:[%s1371_s1 + $0x120] sm:$0xff] }
  0xbf   :  { %v1064_v0 = vmul.f32 %v870_v59, %v983_v37  ;;  %416 = vmatpush.msra.mxu2 %v387_v53 }
  0xc0   :  { %273 = vrot.lane.b32.xlu1 %v248_v62, %s906_s16  ;;  %330 = vmatpush.msra.mxu1 %v299_v18 }
  0xc1   :  { %v224_v1 = vadd.f32 %v216_v60, %v1064_v0 }
  0xc2   :  { %331 = vmatpush.msra.mxu1 %v298_v19 }
  0xc3   :  { %v228_v6 = vrot.slane %v224_v1, 7  ;;  %v241_v7 = vrot.slane %v224_v1, 1 }
  0xc5   :  { %v243_v10 = vsel %vm242_vm6, %v240_v55, %v241_v7  ;;  %v246_v11 = vsel %vm242_vm6, %v241_v7, %v238_v33  ;;  %v233_v37 = vsel %vm229_vm7, %v228_v6, %v225_v32  ;;  %v230_v8 = vsel %vm229_vm7, %v227_v54, %v228_v6  ;;  %v386_v54 = vld [vmem:[%s1371_s1 + $0x118] sm:$0xff]  ;;  %v385_v7 = vld [vmem:[%s1371_s1 + $0x110] sm:$0xff] }
  0xc6   :  { %275 = vrot.lane.b32.xlu0 %v243_v10, %s906_s16  ;;  %v250_v12 = vmul.f32 %v1069_v9, %v246_v11  ;;  %v234_v21 = vmul.f32 %v993_v61, %v233_v37  ;;  %417 = vmatpush.msra.mxu2 %v386_v54 }
  0xc8   :  { %261 = vrot.lane.b32.xlu1 %v224_v1, %s905_s5  ;;  %277 = vrot.lane.b32.xlu2 %v250_v12, %s906_s16 }
  0xc9   :  { %418 = vmatpush.msra.mxu2 %v385_v7 }
 0x105   :  { %v256_v20 = vpop.permute.xlu2 %255 }
 0x106   :  { %v284_v23 = vsel %vm283_vm11, %v234_v21, %v256_v20 }
 0x110   :  { %v272_v24 = vpop.permute.xlu2 %271 }
 0x111   :  { %v289_v27 = vsel %vm288_vm12, %v284_v23, %v272_v24 }
 0x112   :  { %v294_v28 = vsel %vm293_vm13, %v289_v27, %v939_v2 }
 0x113   :  { %332 = vmatmul.f32.vlgmr.msra.gmra.mxu1 %v294_v28 }
 0x118   :  { %v260_v13 = vpop.permute.xlu2 %259 }
 0x119   :  { %v286_v35 = vsel %vm283_vm11, %v236_v34, %v260_v13  ;;  %v842_v34 = vld [vmem:[%s1373_s2 + $0x3] ss:$0 sm:$0xff] }
 0x122   :  { %v278_v42 = vpop.permute.xlu2 %277 }
 0x125   :  { %v258_v29 = vpop.permute.xlu0 %257 }
 0x126   :  { %v285_v30 = vsel %vm283_vm11, %v1043_v47, %v258_v29  ;;  %v841_v47 = vld [vmem:[%s1373_s2 + $0x1] ss:$0 sm:$0xff] }
 0x132   :  { %v274_v31 = vpop.permute.xlu1 %273 }
 0x133   :  { %v290_v32 = vsel %vm288_vm12, %v285_v30, %v274_v31 }
 0x134   :  { %v295_v33 = vsel %vm293_vm13, %v290_v32, %v953_v4 }
 0x135   :  { %335 = vmatmul.f32.gmra.mxu1 %v295_v33 }
 0x138   :  { %v276_v36 = vpop.permute.xlu0 %275 }
 0x139   :  { %v291_v38 = vsel %vm288_vm12, %v286_v35, %v276_v36 }
 0x13a   :  { %v262_v39 = vpop.permute.xlu1 %261  ;;  %v296_v40 = vsel %vm293_vm13, %v291_v38, %v944_v3 }
 0x13b   :  { %v287_v41 = vsel %vm283_vm11, %v230_v8, %v262_v39 }
 0x13c   :  { %v292_v43 = vsel %vm288_vm12, %v287_v41, %v278_v42 }
 0x13d   :  { %338 = vmatmul.f32.gmra.mxu1 %v296_v40  ;;  %v297_v44 = vsel %vm293_vm13, %v292_v43, %v958_v5 }
 0x145   :  { %341 = vmatmul.f32.gmra.mxu1 %v297_v44 }
 0x190   :  { %v333_v48 = vpop.f32.mrf.mxu1 }
 0x191   :  { %v334_v49 = vadd.f32 %v841_v47, %v333_v48 }
 0x193   :  { %871 = vtanh.f32 %v334_v49  ;;  %v345_v10 = vmul.f32 0.5, %v334_v49 }
 0x199   :  { %v872_v50 = vpop.eup %871 }
 0x19a   :  { %369 = vrot.lane.b32.xlu0 %v872_v50, %s907_s8 }
 0x1b2   :  { %v336_v55 = vpop.f32.mrf.mxu1 }
 0x1b3   :  { %v337_v57 = vadd.f32 %v841_v47, %v336_v55 }
 0x1b5   :  { %873 = vtanh.f32 %v337_v57  ;;  %v346_v14 = vmul.f32 0.5, %v337_v57 }
 0x1ba   :  { %v339_v58 = vpop.f32.mrf.mxu1 }
 0x1bb   :  { %v874_v22 = vpop.eup %873  ;;  %v340_v59 = vadd.f32 %v841_v47, %v339_v58 }
 0x1bc   :  { %371 = vrot.lane.b32.xlu1 %v874_v22, %s907_s8 }
 0x1bd   :  { %875 = vtanh.f32 %v340_v59  ;;  %v347_v15 = vmul.f32 0.5, %v340_v59 }
 0x1c2   :  { %v342_v60 = vpop.f32.mrf.mxu1 }
 0x1c3   :  { %v876_v62 = vpop.eup %875  ;;  %v343_v1 = vadd.f32 %v841_v47, %v342_v60 }
 0x1c4   :  { %373 = vrot.lane.b32.xlu2 %v876_v62, %s907_s8  ;;  %444 = vrot.lane.b32.xlu1 %v939_v2, %s908_s15 }
 0x1c5   :  { %877 = vtanh.f32 %v343_v1  ;;  %v348_v18 = vmul.f32 0.5, %v343_v1 }
 0x1c6   :  { %879 = vtanh.f32 %v345_v10 }
 0x1c7   :  { %881 = vtanh.f32 %v346_v14 }
 0x1c8   :  { %883 = vtanh.f32 %v347_v15 }
 0x1c9   :  { %885 = vtanh.f32 %v348_v18 }
 0x1cb   :  { %v878_v6 = vpop.eup %877 }
 0x1cc   :  { %375 = vrot.lane.b32.xlu0 %v878_v6, %s907_s8  ;;  %450 = vrot.lane.b32.xlu1 %v958_v5, %s908_s15  ;;  %v880_v11 = vpop.eup %879 }
 0x1cd   :  { %446 = vrot.lane.b32.xlu2 %v953_v4, %s908_s15  ;;  %v353_v37 = vadd.f32 1.0, %v880_v11  ;;  %v882_v16 = vpop.eup %881 }
 0x1ce   :  { %v354_v17 = vadd.f32 1.0, %v882_v16  ;;  %v884_v20 = vpop.eup %883 }
 0x1cf   :  { %v357_v8 = vmul.f32 0.5, %v353_v37  ;;  %v355_v24 = vadd.f32 1.0, %v884_v20  ;;  %v886_v29 = vpop.eup %885  ;;  %v542_v20 = vld [vmem:[%s1371_s1 + $0x100] sm:$0xff] }
 0x1d0   :  { %v358_v19 = vmul.f32 0.5, %v354_v17  ;;  %v356_v31 = vadd.f32 1.0, %v886_v29  ;;  %v534_v29 = vld [vmem:[%s1371_s1 + $0xc0] sm:$0xff] }
 0x1d1   :  { %v359_v28 = vmul.f32 0.5, %v355_v24  ;;  %v537_v24 = vld [vmem:[%s1371_s1 + $0xd8] sm:$0xff] }
 0x1d2   :  { %v360_v32 = vmul.f32 0.5, %v356_v31  ;;  %v532_v31 = vld [vmem:[%s1371_s1 + $0xb0] sm:$0xff] }
 0x1d4   :  { %448 = vrot.lane.b32.xlu0 %v944_v3, %s908_s15 }
 0x20c   :  { %v370_v12 = vpop.permute.xlu0 %369 }
 0x20d   :  { %v381_v45 = vmul.f32 %v370_v12, %v357_v8 }
 0x20f   :  { %809 = vmatmul.msk.f32.vlgmr.msra.gmra.mxu2 %vm283_vm11, %v381_v45 }
 0x21e   :  { %v374_v27 = vpop.permute.xlu2 %373 }
 0x21f   :  { %v383_v30 = vmul.f32 %v374_v27, %v359_v28  ;;  %v536_v27 = vld [vmem:[%s1371_s1 + $0xd0] sm:$0xff]  ;;  %v535_v28 = vld [vmem:[%s1371_s1 + $0xc8] sm:$0xff] }
 0x227   :  { %v447_v47 = vpop.permute.xlu2 %446 }
 0x22e   :  { %v372_v21 = vpop.permute.xlu1 %371 }
 0x22f   :  { %v382_v23 = vmul.f32 %v372_v21, %v358_v19  ;;  %v543_v19 = vld [vmem:[%s1371_s1 + $0x108] sm:$0xff] }
 0x230   :  { %546 = vmatpush.msra.mxu3 %v543_v19  ;;  %v539_v21 = vld [vmem:[%s1371_s1 + $0xe8] sm:$0xff] }
 0x231   :  { %810 = vmatmul.msk.f32.gmra.mxu2 %vm283_vm11, %v382_v23  ;;  %v538_v23 = vld [vmem:[%s1371_s1 + $0xe0] sm:$0xff] }
 0x232   :  { %547 = vmatpush.msra.mxu3 %v542_v20 }
 0x234   :  { %548 = vmatpush.msra.mxu3 %v541_v25 }
 0x236   :  { %v445_v39 = vpop.permute.xlu1 %444 }
 0x239   :  { %811 = vmatmul.msk.f32.gmra.mxu2 %vm283_vm11, %v383_v30  ;;  %v533_v30 = vld [vmem:[%s1371_s1 + $0xb8] sm:$0xff] }
 0x23e   :  { %v376_v33 = vpop.permute.xlu0 %375  ;;  %v451_v37 = vpop.permute.xlu1 %450 }
 0x23f   :  { %v384_v13 = vmul.f32 %v376_v33, %v360_v32  ;;  %v531_v32 = vld [vmem:[%s1371_s1 + $0xa8] sm:$0xff]  ;;  %v530_v33 = vld [vmem:[%s1371_s1 + $0xa0] sm:$0xff] }
 0x241   :  { %812 = vmatmul.msk.f32.gmra.mxu2 %vm283_vm11, %v384_v13  ;;  %v529_v13 = vld [vmem:[%s1371_s1 + $0x98] sm:$0xff] }
 0x246   :  { %v449_v22 = vpop.permute.xlu0 %448 }
 0x292   :  { %v420_v35 = vpop.f32.mrf.mxu2 }
 0x293   :  { %v1153_v36 = vadd.f32 %v842_v34, %v420_v35 }
 0x295   :  { %v432_v38 = vadd.f32 %v1153_v36, %v996_v63 }
 0x297   :  { %v436_v40 = vmul.f32 0.70710677, %v432_v38 }
 0x299   :  { %v456_v41 = vadd.f32 %v445_v39, %v436_v40 }
 0x29b   :  { %488 = vrot.lane.b32.xlu2 %v456_v41, %s905_s5  ;;  %v460_v50 = vrot.slane %v456_v41, 7  ;;  %v472_v53 = vrot.slane %v456_v41, 1 }
 0x2b4   :  { %v423_v42 = vpop.f32.mrf.mxu2 }
 0x2b5   :  { %v1158_v43 = vadd.f32 %v842_v34, %v423_v42 }
 0x2b7   :  { %v433_v44 = vadd.f32 %v1158_v43, %v1020_v26 }
 0x2b9   :  { %v437_v48 = vmul.f32 0.70710677, %v433_v44 }
 0x2bb   :  { %v457_v49 = vadd.f32 %v447_v47, %v437_v48 }
 0x2bc   :  { %v426_v52 = vpop.f32.mrf.mxu2 }
 0x2bd   :  { %v461_v54 = vrot.slane %v457_v49, 7  ;;  %v473_v55 = vrot.slane %v457_v49, 1  ;;  %v1162_v63 = vadd.f32 %v842_v34, %v426_v52  ;;  %490 = vrot.lane.b32.xlu1 %v457_v49, %s905_s5 }
 0x2bf   :  { %v434_v57 = vadd.f32 %v1162_v63, %v1050_v51  ;;  %v478_v58 = vsel %vm242_vm6, %v472_v53, %v473_v55  ;;  %v1171_v26 = vsel %vm229_vm7, %v460_v50, %v461_v54 }
 0x2c0   :  { %504 = vrot.lane.b32.xlu0 %v478_v58, %s906_s16 }
 0x2c1   :  { %v438_v59 = vmul.f32 0.70710677, %v434_v57 }
 0x2c3   :  { %v458_v60 = vadd.f32 %v449_v22, %v438_v59 }
 0x2c4   :  { %v429_v62 = vpop.f32.mrf.mxu2 }
 0x2c5   :  { %v462_v1 = vrot.slane %v458_v60, 7  ;;  %v474_v6 = vrot.slane %v458_v60, 1  ;;  %v1174_v7 = vadd.f32 %v842_v34, %v429_v62  ;;  %v528_v34 = vld [vmem:[%s1371_s1 + $0x90] sm:$0xff]  ;;  %v617_v62 = vld [vmem:[%s1371_s1 + $0x140] sm:$0xff] }
 0x2c7   :  { %v435_v51 = vadd.f32 %v1174_v7, %v1064_v0  ;;  %v477_v10 = vsel %vm242_vm6, %v473_v55, %v474_v6  ;;  %v1182_v11 = vsel %vm229_vm7, %v461_v54, %v462_v1 }
 0x2c8   :  { %492 = vrot.lane.b32.xlu0 %v458_v60, %s905_s5  ;;  %v481_v8 = vmul.f32 %v1055_v56, %v477_v10  ;;  %v470_v52 = vmul.f32 %v988_v46, %v1182_v11  ;;  %v843_v46 = vld [vmem:[%s1373_s2 + $0x2] ss:$0 sm:$0xff] }
 0x2c9   :  { %v439_v12 = vmul.f32 0.70710677, %v435_v51 }
 0x2ca   :  { %506 = vrot.lane.b32.xlu2 %v481_v8, %s906_s16 }
 0x2cb   :  { %v459_v45 = vadd.f32 %v451_v37, %v439_v12 }
 0x2cd   :  { %v463_v14 = vrot.slane %v459_v45, 7  ;;  %v475_v15 = vrot.slane %v459_v45, 1 }
 0x2cf   :  { %v476_v0 = vsel %vm242_vm6, %v474_v6, %v475_v15  ;;  %v479_v16 = vsel %vm242_vm6, %v475_v15, %v472_v53  ;;  %v467_v17 = vsel %vm229_vm7, %v463_v14, %v460_v50  ;;  %v464_v18 = vsel %vm229_vm7, %v462_v1, %v463_v14  ;;  %v616_v14 = vld [vmem:[%s1371_s1 + $0x138] sm:$0xff]  ;;  %v615_v15 = vld [vmem:[%s1371_s1 + $0x130] sm:$0xff] }
 0x2d0   :  { %508 = vrot.lane.b32.xlu1 %v476_v0, %s906_s16  ;;  %v483_v56 = vmul.f32 %v1069_v9, %v479_v16  ;;  %v540_v9 = vld [vmem:[%s1371_s1 + $0xf0] sm:$0xff]  ;;  %v468_v38 = vmul.f32 %v993_v61, %v467_v17 }
 0x2d1   :  { %549 = vmatpush.msra.mxu3 %v540_v9 }
 0x2d2   :  { %510 = vrot.lane.b32.xlu0 %v483_v56, %s906_s16  ;;  %494 = vrot.lane.b32.xlu2 %v459_v45, %s905_s5 }
 0x2d3   :  { %550 = vmatpush.msra.mxu3 %v539_v21 }
 0x2d5   :  { %551 = vmatpush.msra.mxu3 %v538_v23 }
 0x2d7   :  { %552 = vmatpush.msra.mxu3 %v537_v24 }
 0x2d9   :  { %553 = vmatpush.msra.mxu3 %v536_v27 }
 0x2db   :  { %554 = vmatpush.msra.mxu3 %v535_v28 }
 0x2dd   :  { %555 = vmatpush.msra.mxu3 %v534_v29 }
 0x2df   :  { %556 = vmatpush.msra.mxu3 %v533_v30 }
 0x2e1   :  { %557 = vmatpush.msra.mxu3 %v532_v31 }
 0x2e3   :  { %558 = vmatpush.msra.mxu3 %v531_v32 }
 0x2e5   :  { %559 = vmatpush.msra.mxu3 %v530_v33 }
 0x2e7   :  { %560 = vmatpush.msra.mxu3 %v529_v13 }
 0x2e9   :  { %561 = vmatpush.msra.mxu3 %v528_v34 }
 0x2f5   :  { %v489_v35 = vpop.permute.xlu2 %488 }
 0x2f6   :  { %v516_v39 = vsel %vm283_vm11, %v468_v38, %v489_v35 }
 0x324   :  { %v507_v48 = vpop.permute.xlu2 %506 }
 0x32c   :  { %v495_v57 = vpop.permute.xlu2 %494 }
 0x32f   :  { %v491_v41 = vpop.permute.xlu1 %490 }
 0x330   :  { %v517_v47 = vsel %vm283_vm11, %v1171_v26, %v491_v41  ;;  %v519_v26 = vsel %vm283_vm11, %v464_v18, %v495_v57  ;;  %v673_v41 = vld [vmem:[%s1371_s1 + $0x168] sm:$0xff] }
 0x331   :  { %v521_v49 = vsel %vm288_vm12, %v517_v47, %v507_v48  ;;  %708 = vmatpush.msrb.mxu2 %v673_v41  ;;  %v671_v48 = vld [vmem:[%s1371_s1 + $0x158] sm:$0xff] }
 0x332   :  { %v505_v40 = vpop.permute.xlu0 %504  ;;  %v525_v50 = vsel %vm293_vm13, %v521_v49, %v953_v4 }
 0x333   :  { %v520_v42 = vsel %vm288_vm12, %v516_v39, %v505_v40  ;;  %v844_v40 = vld [vmem:[%s1373_s2 + $0x4] ss:$0 sm:$0xff] }
 0x334   :  { %v524_v44 = vsel %vm293_vm13, %v520_v42, %v939_v2  ;;  %v672_v42 = vld [vmem:[%s1371_s1 + $0x160] sm:$0xff] }
 0x335   :  { %562 = vmatmul.f32.vlgmr.msra.gmra.mxu3 %v524_v44  ;;  %709 = vmatpush.msrb.mxu2 %v672_v42 }
 0x337   :  { %710 = vmatpush.msrb.mxu2 %v671_v48 }
 0x33a   :  { %v493_v61 = vpop.permute.xlu0 %492 }
 0x33b   :  { %v518_v53 = vsel %vm283_vm11, %v470_v52, %v493_v61 }
 0x33d   :  { %565 = vmatmul.f32.gmra.mxu3 %v525_v50  ;;  %v670_v50 = vld [vmem:[%s1371_s1 + $0x150] sm:$0xff] }
 0x33e   :  { %711 = vmatpush.msrb.mxu2 %v670_v50 }
 0x342   :  { %v509_v54 = vpop.permute.xlu1 %508 }
 0x343   :  { %v522_v2 = vsel %vm288_vm12, %v518_v53, %v509_v54 }
 0x344   :  { %v526_v55 = vsel %vm293_vm13, %v522_v2, %v944_v3  ;;  %v511_v58 = vpop.permute.xlu0 %510  ;;  %v618_v3 = vld [vmem:[%s1371_s1 + $0x148] sm:$0xff] }
 0x345   :  { %568 = vmatmul.f32.gmra.mxu3 %v526_v55  ;;  %v523_v4 = vsel %vm288_vm12, %v519_v26, %v511_v58  ;;  %645 = vmatpush.msrb.mxu0 %v618_v3  ;;  %v731_v3 = vld [vmem:[%s1371_s1 + $0x180] sm:$0xff] }
 0x346   :  { %v527_v22 = vsel %vm293_vm13, %v523_v4, %v958_v5 }
 0x347   :  { %646 = vmatpush.msrb.mxu0 %v617_v62  ;;  %v730_v62 = vld [vmem:[%s1371_s1 + $0x178] sm:$0xff] }
 0x349   :  { %647 = vmatpush.msrb.mxu0 %v616_v14 }
 0x34b   :  { %648 = vmatpush.msrb.mxu0 %v615_v15 }
 0x34d   :  { %571 = vmatmul.f32.gmra.mxu3 %v527_v22 }
 0x3b8   :  { %v563_v59 = vpop.f32.mrf.mxu3 }
 0x3b9   :  { %v564_v60 = vadd.f32 %v843_v46, %v563_v59 }
 0x3bb   :  { %887 = vtanh.f32 %v564_v60  ;;  %v575_v0 = vmul.f32 0.5, %v564_v60 }
 0x3c0   :  { %v566_v1 = vpop.f32.mrf.mxu3 }
 0x3c1   :  { %v888_v5 = vpop.eup %887  ;;  %v567_v6 = vadd.f32 %v843_v46, %v566_v1  ;;  %v729_v1 = vld [vmem:[%s1371_s1 + $0x170] sm:$0xff] }
 0x3c2   :  { %599 = vrot.lane.b32.xlu1 %v888_v5, %s907_s8  ;;  %v845_v5 = vld [vmem:[%s1373_s2 + $0x5] ss:$0 sm:$0xff] }
 0x3c3   :  { %889 = vtanh.f32 %v567_v6  ;;  %v576_v16 = vmul.f32 0.5, %v567_v6 }
 0x3c8   :  { %v569_v51 = vpop.f32.mrf.mxu3 }
 0x3c9   :  { %v890_v10 = vpop.eup %889  ;;  %v570_v11 = vadd.f32 %v843_v46, %v569_v51 }
 0x3ca   :  { %601 = vrot.lane.b32.xlu2 %v890_v10, %s907_s8 }
 0x3cb   :  { %891 = vtanh.f32 %v570_v11  ;;  %v577_v56 = vmul.f32 0.5, %v570_v11 }
 0x3d0   :  { %v572_v37 = vpop.f32.mrf.mxu3 }
 0x3d1   :  { %v892_v8 = vpop.eup %891  ;;  %v573_v12 = vadd.f32 %v843_v46, %v572_v37 }
 0x3d2   :  { %603 = vrot.lane.b32.xlu0 %v892_v8, %s907_s8 }
 0x3d3   :  { %893 = vtanh.f32 %v573_v12  ;;  %v578_v23 = vmul.f32 0.5, %v573_v12 }
 0x3d4   :  { %895 = vtanh.f32 %v575_v0 }
 0x3d5   :  { %897 = vtanh.f32 %v576_v16 }
 0x3d6   :  { %899 = vtanh.f32 %v577_v56 }
 0x3d7   :  { %901 = vtanh.f32 %v578_v23 }
 0x3d9   :  { %v894_v45 = vpop.eup %893 }
 0x3da   :  { %605 = vrot.lane.b32.xlu1 %v894_v45, %s907_s8  ;;  %v896_v17 = vpop.eup %895 }
 0x3db   :  { %v583_v18 = vadd.f32 1.0, %v896_v17  ;;  %v898_v20 = vpop.eup %897  ;;  %v846_v17 = vld [vmem:[%s1373_s2 + $0x6] ss:$0 sm:$0xff] }
 0x3dc   :  { %v584_v21 = vadd.f32 1.0, %v898_v20  ;;  %v900_v28 = vpop.eup %899 }
 0x3dd   :  { %v587_v19 = vmul.f32 0.5, %v583_v18  ;;  %v585_v30 = vadd.f32 1.0, %v900_v28  ;;  %v902_v32 = vpop.eup %901 }
 0x3de   :  { %v588_v27 = vmul.f32 0.5, %v584_v21  ;;  %v586_v34 = vadd.f32 1.0, %v902_v32 }
 0x3df   :  { %v589_v31 = vmul.f32 0.5, %v585_v30 }
 0x3e0   :  { %v590_v35 = vmul.f32 0.5, %v586_v34 }
 0x424   :  { %v602_v24 = vpop.permute.xlu2 %601 }
 0x425   :  { %v612_v29 = vmul.f32 %v602_v24, %v588_v27 }
 0x434   :  { %v600_v25 = vpop.permute.xlu1 %599 }
 0x435   :  { %v611_v9 = vmul.f32 %v600_v25, %v587_v19 }
 0x437   :  { %813 = vmatmul.msk.f32.vlgmr.msrb.gmra.mxu0 %vm283_vm11, %v611_v9 }
 0x43f   :  { %814 = vmatmul.msk.f32.gmra.mxu0 %vm283_vm11, %v612_v29 }
 0x444   :  { %v604_v33 = vpop.permute.xlu0 %603 }
 0x445   :  { %v613_v13 = vmul.f32 %v604_v33, %v589_v31 }
 0x447   :  { %815 = vmatmul.msk.f32.gmra.mxu0 %vm283_vm11, %v613_v13 }
 0x44c   :  { %v606_v38 = vpop.permute.xlu1 %605 }
 0x44d   :  { %v614_v39 = vmul.f32 %v606_v38, %v590_v35 }
 0x44f   :  { %816 = vmatmul.msk.f32.gmra.mxu0 %vm283_vm11, %v614_v39 }
 0x4b4   :  { %v650_v44 = vpop.f32.mrf.mxu0 }
 0x4b5   :  { %v651_v47 = vadd.f32 %v844_v40, %v650_v44 }
 0x4b7   :  { %v662_v49 = vadd.f32 %v651_v47, %v1153_v36 }
 0x4b9   :  { %v666_v61 = vmul.f32 0.70710677, %v662_v49 }
 0x4bb   :  { %680 = vrot.lane.b32.xlu2 %v666_v61, %s907_s8 }
 0x4bc   :  { %v653_v52 = vpop.f32.mrf.mxu0 }
 0x4bd   :  { %v654_v53 = vadd.f32 %v844_v40, %v653_v52 }
 0x4bf   :  { %v663_v54 = vadd.f32 %v654_v53, %v1158_v43  ;;  %v732_v43 = vld [vmem:[%s1371_s1 + $0x188] sm:$0xff] }
 0x4c0   :  { %759 = vmatpush.msra.mxu0 %v732_v43  ;;  %826 = vmatpush.msrb.mxu3 %v732_v43 }
 0x4c1   :  { %v667_v2 = vmul.f32 0.70710677, %v663_v54  ;;  %825 = vmatpush.msrb.mxu1 %v732_v43 }
 0x4c2   :  { %760 = vmatpush.msra.mxu0 %v731_v3  ;;  %828 = vmatpush.msrb.mxu3 %v731_v3 }
 0x4c3   :  { %682 = vrot.lane.b32.xlu0 %v667_v2, %s907_s8  ;;  %827 = vmatpush.msrb.mxu1 %v731_v3 }
 0x4c4   :  { %v656_v55 = vpop.f32.mrf.mxu0  ;;  %761 = vmatpush.msra.mxu0 %v730_v62  ;;  %830 = vmatpush.msrb.mxu3 %v730_v62 }
 0x4c5   :  { %v657_v57 = vadd.f32 %v844_v40, %v656_v55  ;;  %829 = vmatpush.msrb.mxu1 %v730_v62 }
 0x4c6   :  { %762 = vmatpush.msra.mxu0 %v729_v1  ;;  %832 = vmatpush.msrb.mxu3 %v729_v1 }
 0x4c7   :  { %v664_v36 = vadd.f32 %v657_v57, %v1162_v63  ;;  %831 = vmatpush.msrb.mxu1 %v729_v1 }
 0x4c9   :  { %v668_v58 = vmul.f32 0.70710677, %v664_v36 }
 0x4cb   :  { %684 = vrot.lane.b32.xlu1 %v668_v58, %s907_s8 }
 0x4cc   :  { %v659_v26 = vpop.f32.mrf.mxu0 }
 0x4cd   :  { %v660_v4 = vadd.f32 %v844_v40, %v659_v26 }
 0x4cf   :  { %v665_v22 = vadd.f32 %v660_v4, %v1174_v7 }
 0x4d1   :  { %v669_v46 = vmul.f32 0.70710677, %v665_v22 }
 0x4d3   :  { %686 = vrot.lane.b32.xlu2 %v669_v46, %s907_s8 }
 0x515   :  { %v681_v59 = vpop.permute.xlu2 %680 }
 0x516   :  { %817 = vmatmul.msk.f32.vlgmr.msrb.gmra.mxu2 %vm283_vm11, %v681_v59 }
 0x52d   :  { %v687_v7 = vpop.permute.xlu2 %686 }
 0x535   :  { %v683_v63 = vpop.permute.xlu0 %682 }
 0x536   :  { %818 = vmatmul.msk.f32.gmra.mxu2 %vm283_vm11, %v683_v63 }
 0x53d   :  { %v685_v60 = vpop.permute.xlu1 %684 }
 0x53e   :  { %819 = vmatmul.msk.f32.gmra.mxu2 %vm283_vm11, %v685_v60 }
 0x546   :  { %820 = vmatmul.msk.f32.gmra.mxu2 %vm283_vm11, %v687_v7 }
 0x599   :  { %v713_v6 = vpop.f32.mrf.mxu2 }
 0x59a   :  { %v714_v51 = vadd.f32 %v845_v5, %v713_v6 }
 0x59c   :  { %v725_v10 = vmax.f32 %v714_v51, 0.0 }
 0x59e   :  { %780 = vrot.lane.b32.xlu0 %v725_v10, %s909_s27  ;;  %821 = vmatmul.msk.f32.vlgmr.msra.gmra.mxu0 %vm283_vm11, %v725_v10 }
 0x5b9   :  { %v716_v11 = vpop.f32.mrf.mxu2 }
 0x5ba   :  { %v717_v37 = vadd.f32 %v845_v5, %v716_v11 }
 0x5bc   :  { %v726_v8 = vmax.f32 %v717_v37, 0.0 }
 0x5be   :  { %822 = vmatmul.msk.f32.vlgmr.msrb.gmra.mxu1 %vm283_vm11, %v726_v8  ;;  %782 = vrot.lane.b32.xlu1 %v726_v8, %s909_s27 }
 0x5c1   :  { %v719_v12 = vpop.f32.mrf.mxu2 }
 0x5c2   :  { %v720_v45 = vadd.f32 %v845_v5, %v719_v12 }
 0x5c4   :  { %v727_v14 = vmax.f32 %v720_v45, 0.0 }
 0x5c6   :  { %784 = vrot.lane.b32.xlu2 %v727_v14, %s909_s27  ;;  %823 = vmatmul.msk.f32.vlgmr.msrb.gmra.mxu3 %vm283_vm11, %v727_v14 }
 0x5c9   :  { %v722_v15 = vpop.f32.mrf.mxu2 }
 0x5ca   :  { %v723_v0 = vadd.f32 %v845_v5, %v722_v15 }
 0x5cc   :  { %v728_v16 = vmax.f32 %v723_v0, 0.0 }
 0x5ce   :  { %786 = vrot.lane.b32.xlu0 %v728_v16, %s909_s27  ;;  %824 = vmatmul.msk.f32.gmra.mxu3 %vm283_vm11, %v728_v16 }
 0x610   :  { %v781_v19 = vpop.permute.xlu0 %780 }
 0x61b   :  { %v764_v18 = vpop.f32.mrf.mxu0 }
 0x61c   :  { %v765_v56 = vadd.f32 %v846_v17, %v764_v18 }
 0x61e   :  { %776 = vst.msk [vmem:[%s1374_s3] sm:$0xff] %vm22_vm0, %v765_v56 }
 0x61f   :  { %793 = vst.msk [vmem:[%s1374_s3] sm:$0xff] %vm792_vm14, %v781_v19 }
 0x620   :  { %v785_v24 = vpop.permute.xlu2 %784 }
 0x630   :  { %v783_v9 = vpop.permute.xlu1 %782 }
 0x63b   :  { %v767_v20 = vpop.f32.mrf.mxu1 }
 0x63c   :  { %v768_v25 = vadd.f32 %v846_v17, %v767_v20 }
 0x63e   :  { %777 = vst.msk [vmem:[%s1374_s3 + $0x8] sm:$0xff] %vm22_vm0, %v768_v25 }
 0x63f   :  { %794 = vst.msk [vmem:[%s1374_s3 + $0x8] sm:$0xff] %vm792_vm14, %v783_v9 }
 0x640   :  { %v787_v29 = vpop.permute.xlu0 %786 }
 0x649   :  { %v770_v21 = vpop.f32.mrf.mxu3 }
 0x64a   :  { %v771_v23 = vadd.f32 %v846_v17, %v770_v21 }
 0x64c   :  { %778 = vst.msk [vmem:[%s1374_s3 + $0x10] sm:$0xff] %vm22_vm0, %v771_v23 }
 0x64d   :  { %795 = vst.msk [vmem:[%s1374_s3 + $0x10] sm:$0xff] %vm792_vm14, %v785_v24 }
 0x651   :  { %v773_v27 = vpop.f32.mrf.mxu3 }
 0x652   :  { %v774_v28 = vadd.f32 %v846_v17, %v773_v27 }
 0x654   :  { %779 = vst.msk [vmem:[%s1374_s3 + $0x18] sm:$0xff] %vm22_vm0, %v774_v28 }
 0x655   :  { %796 = vst.msk [vmem:[%s1374_s3 + $0x18] sm:$0xff] %vm792_vm14, %v787_v29 }

</bundles_post_ra>
